<compile_context>
chip_gen: v7x
topology: tpu7x:2x2x1
jax: 0.10.0
libtpu: 0.0.40
codegen_flags: <defaults>
</compile_context>

<pallas_src>
import functools

import jax
import jax.numpy as jnp
from jax.experimental import pallas as pl
from jax.experimental.pallas import tpu as pltpu  # noqa: F401  (kept for TPU-specific tuning)

TAU = 0.05
NORM_EPS = 1e-12  # F.normalize default eps


def _hotr_indexing_kernel(rel_ref, entT_ref, w_ref, b_ref, out_ref, *,
                          L, B, Nq, Ne, D, pack):
    # rel_ref  : (B*L*Nq, D)   rel queries, rows ordered (b, l, q)
    # entT_ref : (B, D, Ne)    entities, transposed and pre-scaled by 1/tau
    # w_ref    : (5D, 2D)      rows 0:D  = layer-1 [wh1 | wo1]
    #                          rows D:3D = layer-2 blockdiag(wh2, wo2)
    #                          rows 3D:  = layer-3 blockdiag(wh3, wo3)
    # b_ref    : (3, 1, 2D)    fused H|O biases
    # out_ref  : (R//k, 128) if pack else (R, Ne), R = B*2*L*Nq
    x = rel_ref[...]                          # [N, D], N = B*L*Nq
    w = w_ref[...]                            # [5D, 2D]
    b = b_ref[...]                            # [3, 1, 2D]
    w1 = w[:D]                                # [D, 2D]
    w2 = w[D:3 * D]                           # [2D, 2D]
    w3 = w[3 * D:]                            # [2D, 2D]

    # Fused 3-layer MLP for both heads in one matmul chain (width 2D).
    y = jnp.maximum(jnp.dot(x, w1, preferred_element_type=jnp.float32) + b[0], 0.0)
    y = jnp.maximum(jnp.dot(y, w2, preferred_element_type=jnp.float32) + b[1], 0.0)
    y = jnp.dot(y, w3, preferred_element_type=jnp.float32) + b[2]          # [N, 2D]

    def l2_normalize(v):
        # x / max(||x||, eps)  ==  x * rsqrt(max(||x||^2, eps^2))  (f32)
        ss = jnp.sum(v * v, axis=-1, keepdims=True)
        return v * jax.lax.rsqrt(jnp.maximum(ss, NORM_EPS * NORM_EPS))

    h = l2_normalize(y[:, :D])                # [N, D]
    o = l2_normalize(y[:, D:])                # [N, D]

    entT = entT_ref[...]                      # [B, D, Ne]  (already / tau)
    LN = L * Nq

    # One fused score matmul per batch: H and O stacked along the sublane axis.
    per_b = []
    for bi in range(B):
        hob = jnp.concatenate(
            [h[bi * LN:(bi + 1) * LN], o[bi * LN:(bi + 1) * LN]], axis=0)  # [2*LN, D]
        per_b.append(
            jnp.dot(hob, entT[bi], preferred_element_type=jnp.float32))     # [2*LN, Ne]
    scores = per_b[0] if B == 1 else jnp.concatenate(per_b, axis=0)  # [R, Ne], rows (b,s,l,q)

    if pack:
        # Lane-dense packing: k row-blocks of the [R, Ne] score matrix are
        # concatenated along lanes -> [R//k, k*Ne] with k*Ne == 128.
        k = 128 // Ne
        rout = scores.shape[0] // k
        pieces = [scores[i * rout:(i + 1) * rout] for i in range(k)]
        packed = pieces[0] if k == 1 else jnp.concatenate(pieces, axis=-1)
        out_ref[...] = packed.astype(out_ref.dtype)
    else:
        out_ref[...] = scores.astype(out_ref.dtype)


def _fuse_params(params):
    """Fuse the 12 per-head weights/biases into one [5D,2D] weight slab + [3,1,2D] biases."""
    wh1, bh1, wh2, bh2, wh3, bh3, wo1, bo1, wo2, bo2, wo3, bo3 = params
    D = wh1.shape[0]
    dt = wh1.dtype
    z = jnp.zeros((D, D), dt)
    w1 = jnp.concatenate([wh1, wo1], axis=1)          # [D, 2D]   (no zero padding)
    w2 = jnp.block([[wh2, z], [z, wo2]])              # [2D, 2D]
    w3 = jnp.block([[wh3, z], [z, wo3]])              # [2D, 2D]
    w_all = jnp.concatenate([w1, w2, w3], axis=0)     # [5D, 2D]
    b_all = jnp.stack([jnp.concatenate([bh1, bo1], axis=1),
                       jnp.concatenate([bh2, bo2], axis=1),
                       jnp.concatenate([bh3, bo3], axis=1)])  # [3, 1, 2D]
    return w_all, b_all


def entities_indexing_head_hotr(entities_features, rel_features, params):
    """params = (wh1,bh1,wh2,bh2,wh3,bh3, wo1,bo1,wo2,bo2,wo3,bo3).

    Returns (h_scores, o_scores), each [L, B, Nq, Ne]; h_scores[l] equals the
    l-th element of PyTorch's outputs_hidx list (same for O).
    """
    L, B, Nq, D = rel_features.shape
    Be, Ne, De = entities_features.shape
    assert Be == B and De == D

    w_all, b_all = _fuse_params(params)
    # Rows ordered (b, l, q) so each batch's rows are contiguous in the kernel.
    rel2d = jnp.transpose(rel_features, (1, 0, 2, 3)).reshape(B * L * Nq, D)
    # Fold 1/tau into entities and pre-transpose to [B, D, Ne] (wrapper-side plumbing).
    entT = jnp.transpose(entities_features * (1.0 / TAU), (0, 2, 1))

    R = B * 2 * L * Nq                                   # total score rows
    pack = (128 % Ne == 0) and (R % (128 // Ne) == 0)    # lane-dense output possible?
    if pack:
        k = 128 // Ne
        rout = R // k
        out_shape = (rout, 128)
    else:
        k, rout = 1, R
        out_shape = (R, Ne)

    kernel = functools.partial(_hotr_indexing_kernel,
                               L=L, B=B, Nq=Nq, Ne=Ne, D=D, pack=pack)

    n_rows = B * L * Nq
    flops = (2 * n_rows * D * (2 * D)            # layer 1
             + 2 * (2 * n_rows * (2 * D) * (2 * D))  # layers 2 & 3
             + 2 * R * D * Ne)                   # score matmuls
    bytes_accessed = 4 * (rel2d.size + entT.size + w_all.size + b_all.size
                          + out_shape[0] * out_shape[1])

    # Single invocation: whole problem lives in VMEM (a few 10s of KiB).
    out = pl.pallas_call(
        kernel,
        out_shape=jax.ShapeDtypeStruct(out_shape, jnp.float32),
        cost_estimate=pl.CostEstimate(flops=flops,
                                      transcendentals=2 * n_rows,
                                      bytes_accessed=bytes_accessed),
    )(rel2d, entT, w_all, b_all)

    # Invert the lane-dense packing (tiny arrays; pure layout plumbing).
    if pack:
        flat = out.reshape(rout, k, Ne).transpose(1, 0, 2).reshape(R, Ne)
    else:
        flat = out
    s5 = flat.reshape(B, 2, L, Nq, Ne)                 # rows were (b, s, l, q)
    h_scores = jnp.transpose(s5[:, 0], (1, 0, 2, 3))   # [L, B, Nq, Ne]
    o_scores = jnp.transpose(s5[:, 1], (1, 0, 2, 3))
    return h_scores, o_scores


def init_params(key, d_model):
    """3-layer MLP (d->d->d->d) weights for both H and O pointer heads.

    Weights stored [in, out] (transpose of nn.Linear); biases [1, out].
    Uniform init with bound 1/sqrt(fan_in), like PyTorch default.
    """
    params = []
    bound = 1.0 / (d_model ** 0.5)
    for _head in ("H", "O"):
        for _layer in range(3):
            key, kw, kb = jax.random.split(key, 3)
            w = jax.random.uniform(kw, (d_model, d_model), jnp.float32, -bound, bound)
            b = jax.random.uniform(kb, (1, d_model), jnp.float32, -bound, bound)
            params += [w, b]
    return tuple(params)


def _reference(entities_features, rel_features, params):
    """Pure-JAX reference mirroring the PyTorch forward (unfused weights)."""
    (wh1, bh1, wh2, bh2, wh3, bh3, wo1, bo1, wo2, bo2, wo3, bo3) = params

    def mlp(x, w1, b1, w2, b2, w3, b3):
        h = jax.nn.relu(x @ w1 + b1[0])
        h = jax.nn.relu(h @ w2 + b2[0])
        return h @ w3 + b3[0]

    def l2n(h):
        n = jnp.sqrt(jnp.sum(h * h, axis=-1, keepdims=True))
        return h / jnp.maximum(n, NORM_EPS)

    H = l2n(mlp(rel_features, wh1, bh1, wh2, bh2, wh3, bh3))   # [L,B,Nq,D]
    O = l2n(mlp(rel_features, wo1, bo1, wo2, bo2, wo3, bo3))
    hs = jnp.einsum("lbqd,bed->lbqe", H, entities_features) / TAU
    os_ = jnp.einsum("lbqd,bed->lbqe", O, entities_features) / TAU
    return hs, os_


if __name__ == "__main__":
    # Small shapes consistent with the module:
    #   D_MODEL=32, decoder layers L=2, batch B=2, rel queries Nq=8, entity queries Ne=16
    D_MODEL, L, B, Nq, Ne = 32, 2, 2, 8, 16

    key = jax.random.PRNGKey(0)
    k_ent, k_rel, k_par = jax.random.split(key, 3)
    entities_features = jax.random.normal(k_ent, (B, Ne, D_MODEL), jnp.float32)
    rel_features = jax.random.normal(k_rel, (L, B, Nq, D_MODEL), jnp.float32)
    params = init_params(k_par, D_MODEL)

    h_scores, o_scores = entities_indexing_head_hotr(
        entities_features, rel_features, params)
    jax.block_until_ready(h_scores)
    jax.block_until_ready(o_scores)

    # Sanity-check against pure-JAX reference.
    ref_h, ref_o = _reference(entities_features, rel_features, params)
    assert jnp.allclose(h_scores, ref_h, atol=1e-4, rtol=1e-4), "H scores mismatch"
    assert jnp.allclose(o_scores, ref_o, atol=1e-4, rtol=1e-4), "O scores mismatch"

    print("KERNEL_OK")
</pallas_src>

<mosaic_0001>
module attributes {stable_mosaic.version = 11 : i64} {
  func.func @_hotr_indexing_kernel(%arg0: memref<32x32xf32, #tpu.memory_space<vmem>>, %arg1: memref<2x32x16xf32, #tpu.memory_space<vmem>>, %arg2: memref<160x64xf32, #tpu.memory_space<vmem>>, %arg3: memref<3x1x64xf32, #tpu.memory_space<vmem>>, %arg4: memref<8x128xf32, #tpu.memory_space<vmem>>) attributes {dimension_semantics = [], scalar_prefetch = 0 : i64, scratch_operands = 0 : i64, tpu.core_type = #tpu.core_type<tc>} {
    %c0 = arith.constant 0 : index
    %c0_0 = arith.constant 0 : index
    %0 = vector.load %arg0[%c0, %c0_0] : memref<32x32xf32, #tpu.memory_space<vmem>>, vector<32x32xf32>
    %c0_1 = arith.constant 0 : index
    %c0_2 = arith.constant 0 : index
    %1 = vector.load %arg2[%c0_1, %c0_2] : memref<160x64xf32, #tpu.memory_space<vmem>>, vector<160x64xf32>
    %c0_3 = arith.constant 0 : index
    %c0_4 = arith.constant 0 : index
    %c0_5 = arith.constant 0 : index
    %2 = vector.load %arg3[%c0_3, %c0_4, %c0_5] : memref<3x1x64xf32, #tpu.memory_space<vmem>>, vector<3x1x64xf32>
    %3 = vector.extract_strided_slice %1 {offsets = [0, 0], sizes = [32, 64], strides = [1, 1]} : vector<160x64xf32> to vector<32x64xf32>
    %4 = vector.extract_strided_slice %1 {offsets = [32, 0], sizes = [64, 64], strides = [1, 1]} : vector<160x64xf32> to vector<64x64xf32>
    %5 = vector.extract_strided_slice %1 {offsets = [96, 0], sizes = [64, 64], strides = [1, 1]} : vector<160x64xf32> to vector<64x64xf32>
    %cst = arith.constant dense<0.000000e+00> : vector<32x64xf32>
    %6 = tpu.matmul %0, %3, %cst {dimension_numbers = #tpu.dot_dimension_numbers<[1], [0], [0], [1], [0, 0, 1, 1], [], []>} : vector<32x32xf32>, vector<32x64xf32>, vector<32x64xf32> -> vector<32x64xf32>
    %7 = vector.extract_strided_slice %2 {offsets = [0, 0, 0], sizes = [1, 1, 64], strides = [1, 1, 1]} : vector<3x1x64xf32> to vector<1x1x64xf32>
    %8 = vector.shape_cast %7 : vector<1x1x64xf32> to vector<1x64xf32>
    %9 = vector.broadcast %8 : vector<1x64xf32> to vector<32x64xf32>
    %10 = arith.addf %6, %9 : vector<32x64xf32>
    %cst_6 = arith.constant 0.000000e+00 : f32
    %11 = vector.broadcast %cst_6 : f32 to vector<32x64xf32>
    %12 = arith.maximumf %10, %11 : vector<32x64xf32>
    %cst_7 = arith.constant dense<0.000000e+00> : vector<32x64xf32>
    %13 = tpu.matmul %12, %4, %cst_7 {dimension_numbers = #tpu.dot_dimension_numbers<[1], [0], [0], [1], [0, 0, 1, 1], [], []>} : vector<32x64xf32>, vector<64x64xf32>, vector<32x64xf32> -> vector<32x64xf32>
    %14 = vector.extract_strided_slice %2 {offsets = [1, 0, 0], sizes = [1, 1, 64], strides = [1, 1, 1]} : vector<3x1x64xf32> to vector<1x1x64xf32>
    %15 = vector.shape_cast %14 : vector<1x1x64xf32> to vector<1x64xf32>
    %16 = vector.broadcast %15 : vector<1x64xf32> to vector<32x64xf32>
    %17 = arith.addf %13, %16 : vector<32x64xf32>
    %cst_8 = arith.constant 0.000000e+00 : f32
    %18 = vector.broadcast %cst_8 : f32 to vector<32x64xf32>
    %19 = arith.maximumf %17, %18 : vector<32x64xf32>
    %cst_9 = arith.constant dense<0.000000e+00> : vector<32x64xf32>
    %20 = tpu.matmul %19, %5, %cst_9 {dimension_numbers = #tpu.dot_dimension_numbers<[1], [0], [0], [1], [0, 0, 1, 1], [], []>} : vector<32x64xf32>, vector<64x64xf32>, vector<32x64xf32> -> vector<32x64xf32>
    %21 = vector.extract_strided_slice %2 {offsets = [2, 0, 0], sizes = [1, 1, 64], strides = [1, 1, 1]} : vector<3x1x64xf32> to vector<1x1x64xf32>
    %22 = vector.shape_cast %21 : vector<1x1x64xf32> to vector<1x64xf32>
    %23 = vector.broadcast %22 : vector<1x64xf32> to vector<32x64xf32>
    %24 = arith.addf %20, %23 : vector<32x64xf32>
    %25 = vector.extract_strided_slice %24 {offsets = [0, 0], sizes = [32, 32], strides = [1, 1]} : vector<32x64xf32> to vector<32x32xf32>
    %26 = arith.mulf %25, %25 : vector<32x32xf32>
    %cst_10 = arith.constant dense<0.000000e+00> : vector<32xf32>
    %27 = vector.multi_reduction <add>, %26, %cst_10 [1] : vector<32x32xf32> to vector<32xf32>
    %28 = vector.shape_cast %27 : vector<32xf32> to vector<32x1xf32>
    %cst_11 = arith.constant 1.000000e-24 : f32
    %29 = vector.broadcast %cst_11 : f32 to vector<32x1xf32>
    %30 = arith.maximumf %28, %29 : vector<32x1xf32>
    %31 = math.rsqrt %30 : vector<32x1xf32>
    %32 = vector.broadcast %31 : vector<32x1xf32> to vector<32x32xf32>
    %33 = arith.mulf %25, %32 : vector<32x32xf32>
    %34 = vector.extract_strided_slice %24 {offsets = [0, 32], sizes = [32, 32], strides = [1, 1]} : vector<32x64xf32> to vector<32x32xf32>
    %35 = arith.mulf %34, %34 : vector<32x32xf32>
    %cst_12 = arith.constant dense<0.000000e+00> : vector<32xf32>
    %36 = vector.multi_reduction <add>, %35, %cst_12 [1] : vector<32x32xf32> to vector<32xf32>
    %37 = vector.shape_cast %36 : vector<32xf32> to vector<32x1xf32>
    %cst_13 = arith.constant 1.000000e-24 : f32
    %38 = vector.broadcast %cst_13 : f32 to vector<32x1xf32>
    %39 = arith.maximumf %37, %38 : vector<32x1xf32>
    %40 = math.rsqrt %39 : vector<32x1xf32>
    %41 = vector.broadcast %40 : vector<32x1xf32> to vector<32x32xf32>
    %42 = arith.mulf %34, %41 : vector<32x32xf32>
    %c0_14 = arith.constant 0 : index
    %c0_15 = arith.constant 0 : index
    %c0_16 = arith.constant 0 : index
    %43 = vector.load %arg1[%c0_14, %c0_15, %c0_16] : memref<2x32x16xf32, #tpu.memory_space<vmem>>, vector<2x32x16xf32>
    %44 = vector.extract_strided_slice %33 {offsets = [0, 0], sizes = [16, 32], strides = [1, 1]} : vector<32x32xf32> to vector<16x32xf32>
    %45 = vector.extract_strided_slice %42 {offsets = [0, 0], sizes = [16, 32], strides = [1, 1]} : vector<32x32xf32> to vector<16x32xf32>
    %46 = tpu.concatenate %44, %45 in 0 : vector<16x32xf32>, vector<16x32xf32> -> vector<32x32xf32>
    %47 = vector.extract_strided_slice %43 {offsets = [0, 0, 0], sizes = [1, 32, 16], strides = [1, 1, 1]} : vector<2x32x16xf32> to vector<1x32x16xf32>
    %48 = vector.shape_cast %47 : vector<1x32x16xf32> to vector<32x16xf32>
    %cst_17 = arith.constant dense<0.000000e+00> : vector<32x16xf32>
    %49 = tpu.matmul %46, %48, %cst_17 {dimension_numbers = #tpu.dot_dimension_numbers<[1], [0], [0], [1], [0, 0, 1, 1], [], []>} : vector<32x32xf32>, vector<32x16xf32>, vector<32x16xf32> -> vector<32x16xf32>
    %50 = vector.extract_strided_slice %33 {offsets = [16, 0], sizes = [16, 32], strides = [1, 1]} : vector<32x32xf32> to vector<16x32xf32>
    %51 = vector.extract_strided_slice %42 {offsets = [16, 0], sizes = [16, 32], strides = [1, 1]} : vector<32x32xf32> to vector<16x32xf32>
    %52 = tpu.concatenate %50, %51 in 0 : vector<16x32xf32>, vector<16x32xf32> -> vector<32x32xf32>
    %53 = vector.extract_strided_slice %43 {offsets = [1, 0, 0], sizes = [1, 32, 16], strides = [1, 1, 1]} : vector<2x32x16xf32> to vector<1x32x16xf32>
    %54 = vector.shape_cast %53 : vector<1x32x16xf32> to vector<32x16xf32>
    %cst_18 = arith.constant dense<0.000000e+00> : vector<32x16xf32>
    %55 = tpu.matmul %52, %54, %cst_18 {dimension_numbers = #tpu.dot_dimension_numbers<[1], [0], [0], [1], [0, 0, 1, 1], [], []>} : vector<32x32xf32>, vector<32x16xf32>, vector<32x16xf32> -> vector<32x16xf32>
    %56 = tpu.concatenate %49, %55 in 0 : vector<32x16xf32>, vector<32x16xf32> -> vector<64x16xf32>
    %57 = vector.extract_strided_slice %56 {offsets = [0, 0], sizes = [8, 16], strides = [1, 1]} : vector<64x16xf32> to vector<8x16xf32>
    %58 = vector.extract_strided_slice %56 {offsets = [8, 0], sizes = [8, 16], strides = [1, 1]} : vector<64x16xf32> to vector<8x16xf32>
    %59 = vector.extract_strided_slice %56 {offsets = [16, 0], sizes = [8, 16], strides = [1, 1]} : vector<64x16xf32> to vector<8x16xf32>
    %60 = vector.extract_strided_slice %56 {offsets = [24, 0], sizes = [8, 16], strides = [1, 1]} : vector<64x16xf32> to vector<8x16xf32>
    %61 = vector.extract_strided_slice %56 {offsets = [32, 0], sizes = [8, 16], strides = [1, 1]} : vector<64x16xf32> to vector<8x16xf32>
    %62 = vector.extract_strided_slice %56 {offsets = [40, 0], sizes = [8, 16], strides = [1, 1]} : vector<64x16xf32> to vector<8x16xf32>
    %63 = vector.extract_strided_slice %56 {offsets = [48, 0], sizes = [8, 16], strides = [1, 1]} : vector<64x16xf32> to vector<8x16xf32>
    %64 = vector.extract_strided_slice %56 {offsets = [56, 0], sizes = [8, 16], strides = [1, 1]} : vector<64x16xf32> to vector<8x16xf32>
    %65 = tpu.concatenate %57, %58, %59, %60, %61, %62, %63, %64 in 1 : vector<8x16xf32>, vector<8x16xf32>, vector<8x16xf32>, vector<8x16xf32>, vector<8x16xf32>, vector<8x16xf32>, vector<8x16xf32>, vector<8x16xf32> -> vector<8x128xf32>
    %c0_19 = arith.constant 0 : index
    %c0_20 = arith.constant 0 : index
    %66 = vector.load %arg4[%c0_19, %c0_20] : memref<8x128xf32, #tpu.memory_space<vmem>>, vector<8x128xf32>
    tpu.vector_store %arg4[%c0_19, %c0_20], %65 {strides = array<i32>} : memref<8x128xf32, #tpu.memory_space<vmem>>, vector<8x128xf32>,
    return
  }
}

</mosaic_0001>

<bundles_post_ra>
// kernel: tpu_custom_call.1
= control target key start
LH: loop header
LB: loop body
LE: loop exit
PB: predicated region body
PF: predicated region fallthrough
CT: control target
= control target key end

     0   :  { %vm51_vm0 = vcmask 261120   ;;  %s1175_s0 = inlined_call_operand.vmem [shape: f32[32,32], index: 0, kind: input, shape index: {}]   ;;  %s1176_s1 = inlined_call_operand.vmem [shape: f32[2,32,16], index: 1, kind: input, shape index: {}]   ;;  %s1177_s2 = inlined_call_operand.vmem [shape: f32[160,64], index: 2, kind: input, shape index: {}]   ;;  %s1178_s3 = inlined_call_operand.vmem [shape: f32[3,1,64], index: 3, kind: input, shape index: {}]   ;;  %s1179_s4 = inlined_call_operand.hbm [shape: f32[8,128], index: 4, kind: output, shape index: {}]  }
   0x1   :  { %v22_v0 = vld [vmem:[%s1177_s2] sm:$0xff]  ;;  %v23_v1 = vld [vmem:[%s1177_s2 + $0x8] sm:$0xff]  ;;  %v24_v2 = vld [vmem:[%s1177_s2 + $0x10] sm:$0xff] }
   0x2   :  { %v854_v3 = vpack.c.bf16 %v23_v1, %v22_v0  ;;  %v25_v4 = vld [vmem:[%s1177_s2 + $0x18] sm:$0xff]  ;;  %v18_v5 = vld [vmem:[%s1175_s0] sm:$0xff]  ;;  %v27_v8 = vld [vmem:[%s1177_s2 + $0x28] sm:$0xff] }
   0x3   :  { %v858_v6 = vpack.c.bf16 %v25_v4, %v24_v2  ;;  %776 = vmatprep.mubr.msk.f32.mxu0 %vm51_vm0, %v18_v5  ;;  %v26_v7 = vld [vmem:[%s1177_s2 + $0x20] sm:$0xff]  ;;  %v28_v9 = vld [vmem:[%s1177_s2 + $0x30] sm:$0xff]  ;;  %v29_v10 = vld [vmem:[%s1177_s2 + $0x38] sm:$0xff] }
   0x4   :  { %855 = vmatprep.subr.bf16.mxu0 %v854_v3  ;;  %v862_v11 = vpack.c.bf16 %v27_v8, %v26_v7  ;;  %v866_v12 = vpack.c.bf16 %v29_v10, %v28_v9 }
   0x5   :  { %857 = vmatpush3.bf16.msra.mxu0 %v854_v3 }
   0x6   :  { %9 = vsyncpa [#allocation3], 0  ;;  %859 = vmatprep.subr.bf16.mxu0 %v858_v6  ;;  %v30_v13 = vld [vmem:[%s1177_s2 + $0x40] sm:$0xff]  ;;  %v31_v14 = vld [vmem:[%s1177_s2 + $0x48] sm:$0xff]  ;;  %863 = vmatprep.subr.bf16.mxu1 %v862_v11  ;;  %vm159_vm1 = vcmask 523264   ;;  %s962_s15 = smov 96  }
   0x7   :  { %865 = vmatpush3.bf16.msra.mxu1 %v862_v11  ;;  %v19_v15 = vld [vmem:[%s1175_s0 + $0x8] sm:$0xff]  ;;  %v870_v16 = vpack.c.bf16 %v31_v14, %v30_v13  ;;  %v20_v17 = vld [vmem:[%s1175_s0 + $0x10] sm:$0xff]  ;;  %v21_v18 = vld [vmem:[%s1175_s0 + $0x18] sm:$0xff]  ;;  %s964_s30 = smov 80   ;;  %s965_s5 = smov 64   ;;  %vm670_vm2 = vcmask 130048  }
   0x8   :  { %867 = vmatprep.subr.bf16.mxu1 %v866_v12  ;;  %v32_v19 = vld [vmem:[%s1177_s2 + $0x50] sm:$0xff]  ;;  %v33_v20 = vld [vmem:[%s1177_s2 + $0x58] sm:$0xff]  ;;  %v34_v22 = vld [vmem:[%s1177_s2 + $0x60] sm:$0xff]  ;;  %s966_s6 = smov 48   ;;  %s967_s7 = smov 32   ;;  %vm673_vm3 = vcmask 392192  }
   0x9   :  { %861 = vmatpush3.bf16.msra.mxu0 %v858_v6  ;;  %v874_v21 = vpack.c.bf16 %v33_v20, %v32_v19  ;;  %v35_v23 = vld [vmem:[%s1177_s2 + $0x68] sm:$0xff]  ;;  %v36_v24 = vld [vmem:[%s1177_s2 + $0x70] sm:$0xff]  ;;  %v37_v26 = vld [vmem:[%s1177_s2 + $0x78] sm:$0xff]  ;;  %s968_s8 = smov 112   ;;  %vm676_vm4 = vcmask 654336   ;;  %vm678_vm5 = vcmask 785408  }
   0xa   :  { %v878_v25 = vpack.c.bf16 %v35_v23, %v34_v22  ;;  %v882_v27 = vpack.c.bf16 %v37_v26, %v36_v24  ;;  %v38_v28 = vld [vmem:[%s1177_s2 + $0x80] sm:$0xff]  ;;  %v39_v29 = vld [vmem:[%s1177_s2 + $0x88] sm:$0xff]  ;;  %v40_v44 = vld [vmem:[%s1177_s2 + $0x90] sm:$0xff]  ;;  %s969_s9 = smov [#allocation2]   ;;  %vm680_vm6 = vcmask 916480  }
   0xb   :  { %869 = vmatpush3.bf16.msra.mxu1 %v866_v12  ;;  %v886_v30 = vpack.c.bf16 %v39_v29, %v38_v28  ;;  %v697_v31 = vld [vmem:[%s1178_s3] ss:$0 sm:$0xff]  ;;  %v41_v45 = vld [vmem:[%s1177_s2 + $0x98] sm:$0xff]  ;;  %v702_v47 = vld [vmem:[%s1178_s3 + $0x1] ss:$0 sm:$0xff]  ;;  %s689_s10 = sshll.u32 %s969_s9, 4  ;;  %s690_s10 = int_to_ptr.vmem [resolvable:$true] %s689_s10 }
   0xc   :  { %777 = vmatmul.mubr.msk.f32.vlgmr.msra.gmra.mrb[0].mxu0 %vm51_vm0, %v19_v15  ;;  %871 = vmatprep.subr.bf16.mxu1 %v870_v16  ;;  %v890_v46 = vpack.c.bf16 %v41_v45, %v40_v44  ;;  %v707_v60 = vld [vmem:[%s1178_s3 + $0x2] ss:$0 sm:$0xff]  ;;  %v433_v22 = vld [vmem:[%s1176_s1 + $0x8] sm:$0xff]  ;;  %v434_v24 = vld [vmem:[%s1176_s1 + $0x10] sm:$0xff]  ;;  %s938_s11 = scalar_lea.vmem %s690_s10, 128  ;;  %p943_p1 = scmp.lt.s32.totalorder %s690_s10, %s690_s10 }
   0xd   :  { %779 = vmatprep.mubr.msk.f32.mxu0 %vm51_vm0, %v20_v17  ;;  %879 = vmatprep.subr.bf16.mxu0 %v878_v25  ;;  %v436_v26 = vld [vmem:[%s1176_s1 + $0x20] sm:$0xff]  ;;  %v437_v28 = vld [vmem:[%s1176_s1 + $0x28] sm:$0xff]  ;;  %p939_p0 = scmp.ne.s32.totalorder %s690_s10, %s938_s11  ;;  %p944_p2 = scmp.lt.s32.totalorder %s938_s11, %s938_s11 }
   0xe   :  { %881 = vmatpush3.bf16.msra.mxu0 %v878_v25  ;;  %v435_v25 = vld [vmem:[%s1176_s1 + $0x18] sm:$0xff]  ;;  %v902_v29 = vpack.c.bf16 %v437_v28, %v436_v26 }
   0xf   :  { %873 = vmatpush3.bf16.msra.mxu1 %v870_v16  ;;  %883 = vmatprep.subr.bf16.mxu0 %v882_v27  ;;  %p945_p3 = por %p944_p2, %p943_p1 }
  0x10   :  { %780 = vmatmul.mubr.msk.f32.gmra.mrb[2].mxu0 %vm51_vm0, %v21_v18  ;;  %875 = vmatprep.subr.bf16.mxu1 %v874_v21 }
  0x11   :  { %p946_p4 = pnand %p945_p3, %p939_p0 }
  0x12   :  { %885 = vmatpush3.bf16.msra.mxu0 %v882_v27  ;;  %v898_v27 = vpack.c.bf16 %v435_v25, %v434_v24 }
  0x13   :  { %877 = vmatpush3.bf16.msra.mxu1 %v874_v21  ;;  %887 = vmatprep.subr.bf16.mxu0 %v886_v30  ;;  %v432_v21 = vld [vmem:[%s1176_s1] sm:$0xff] }
  0x14   :  { %v894_v23 = vpack.c.bf16 %v433_v22, %v432_v21 }
  0x16   :  { %889 = vmatpush3.bf16.msra.mxu0 %v886_v30  ;;  %895 = vmatprep.subr.bf16.mxu1 %v894_v23  ;;  %v438_v30 = vld [vmem:[%s1176_s1 + $0x30] sm:$0xff] }
  0x17   :  { %891 = vmatprep.subr.bf16.mxu0 %v890_v46 }
  0x1a   :  { %893 = vmatpush3.bf16.msra.mxu0 %v890_v46 }
  0x1b   :  { %903 = vmatprep.subr.bf16.mxu0 %v902_v29 }
  0xdf   :  { %v778_v32 = vpop.f32.mrb[0].mxu0 }
  0xe0   :  { %v136_v33 = vadd.f32 %v778_v32, %v697_v31  ;;  %v130_v34 = vpop.f32.mrb[1].mxu0 }
  0xe1   :  { %v131_v35 = vadd.f32 %v697_v31, %v130_v34 }
  0xe2   :  { %v150_v38 = vmax.f32 %v136_v33, 0.0 }
  0xe3   :  { %v149_v36 = vmax.f32 %v131_v35, 0.0  ;;  %v781_v37 = vpop.f32.mrb[2].mxu0 }
  0xe4   :  { %v146_v39 = vadd.f32 %v781_v37, %v697_v31  ;;  %v140_v40 = vpop.f32.mrb[3].mxu0 }
  0xe5   :  { %v141_v41 = vadd.f32 %v697_v31, %v140_v40  ;;  %798 = vmatprep.mubr.msk.f32.mxu1 %vm159_vm1, %v149_v36  ;;  %v439_v31 = vld [vmem:[%s1176_s1 + $0x38] sm:$0xff]  ;;  %s963_s1 = smov 16  }
  0xe6   :  { %799 = vmatmul.mubr.msk.f32.vlgmr.msra.gmra.mrb[0].mxu1 %vm159_vm1, %v150_v38  ;;  %v152_v43 = vmax.f32 %v146_v39, 0.0  ;;  %v906_v32 = vpack.c.bf16 %v439_v31, %v438_v30 }
  0xe7   :  { %v151_v42 = vmax.f32 %v141_v41, 0.0  ;;  %897 = vmatpush3.bf16.msra.mxu1 %v894_v23 }
  0xe8   :  { %899 = vmatprep.subr.bf16.mxu1 %v898_v27 }
  0xe9   :  { %801 = vmatprep.mubr.msk.f32.mxu1 %vm159_vm1, %v151_v42 }
  0xea   :  { %802 = vmatmul.mubr.msk.f32.gmra.mrb[2].mxu1 %vm159_vm1, %v152_v43 }
  0xeb   :  { %901 = vmatpush3.bf16.msra.mxu1 %v898_v27 }
  0xec   :  { %910 = vmatprep.subr.bf16.mxu1 %v902_v29 }
 0x1b9   :  { %v800_v48 = vpop.f32.mrb[0].mxu1 }
 0x1ba   :  { %v244_v49 = vadd.f32 %v800_v48, %v702_v47  ;;  %v238_v50 = vpop.f32.mrb[1].mxu1 }
 0x1bb   :  { %v239_v51 = vadd.f32 %v702_v47, %v238_v50 }
 0x1bc   :  { %v258_v54 = vmax.f32 %v244_v49, 0.0 }
 0x1bd   :  { %v257_v52 = vmax.f32 %v239_v51, 0.0  ;;  %v803_v53 = vpop.f32.mrb[2].mxu1 }
 0x1be   :  { %v254_v55 = vadd.f32 %v803_v53, %v702_v47  ;;  %v248_v56 = vpop.f32.mrb[3].mxu1 }
 0x1bf   :  { %v249_v57 = vadd.f32 %v702_v47, %v248_v56  ;;  %820 = vmatprep.mubr.msk.f32.mxu0 %vm159_vm1, %v257_v52 }
 0x1c0   :  { %821 = vmatmul.mubr.msk.f32.vlgmr.msra.gmra.mrb[4].mxu0 %vm159_vm1, %v258_v54  ;;  %v260_v59 = vmax.f32 %v254_v55, 0.0 }
 0x1c1   :  { %v259_v58 = vmax.f32 %v249_v57, 0.0  ;;  %905 = vmatpush3.bf16.msra.mxu0 %v902_v29 }
 0x1c2   :  { %907 = vmatprep.subr.bf16.mxu0 %v906_v32 }
 0x1c3   :  { %823 = vmatprep.mubr.msk.f32.mxu0 %vm159_vm1, %v259_v58 }
 0x1c4   :  { %824 = vmatmul.mubr.msk.f32.gmra.mrb[6].mxu0 %vm159_vm1, %v260_v59 }
 0x1c5   :  { %909 = vmatpush3.bf16.msra.mxu0 %v906_v32 }
 0x293   :  { %v822_v61 = vpop.f32.mrb[4].mxu0 }
 0x294   :  { %v345_v62 = vpop.f32.mrb[5].mxu0  ;;  %v1090_v0 = vadd.f32 %v822_v61, %v707_v60 }
 0x295   :  { %v1088_v63 = vadd.f32 %v707_v60, %v345_v62 }
 0x296   :  { %v365_v7 = vmul.f32 %v1090_v0, %v1090_v0 }
 0x297   :  { %v825_v1 = vpop.f32.mrb[6].mxu0  ;;  %v364_v2 = vmul.f32 %v1088_v63, %v1088_v63 }
 0x298   :  { %v355_v3 = vpop.f32.mrb[7].mxu0  ;;  %v1097_v5 = vadd.f32 %v825_v1, %v707_v60  ;;  %v371_v18 = vsel %vm51_vm0, %v365_v7, 0.0 }
 0x299   :  { %v1094_v4 = vadd.f32 %v707_v60, %v355_v3  ;;  %396 = vrot.lane.b32.xlu0 %v364_v2, %s962_s15  ;;  %v368_v17 = vsel %vm51_vm0, %v364_v2, 0.0 }
 0x29a   :  { %v367_v8 = vmul.f32 %v1097_v5, %v1097_v5 }
 0x29b   :  { %v366_v6 = vmul.f32 %v1094_v4, %v1094_v4 }
 0x29c   :  { %v377_v20 = vsel %vm51_vm0, %v367_v8, 0.0 }
 0x29d   :  { %400 = vrot.lane.b32.xlu1 %v366_v6, %s962_s15  ;;  %398 = vrot.lane.b32.xlu0 %v365_v7, %s962_s15  ;;  %v374_v19 = vsel %vm51_vm0, %v366_v6, 0.0 }
 0x2a1   :  { %402 = vrot.lane.b32.xlu1 %v367_v8, %s962_s15 }
 0x30b   :  { %v397_v9 = vpop.permute.xlu0 %396 }
 0x30c   :  { %v408_v10 = vsel %vm51_vm0, %v397_v9, 0.0 }
 0x30d   :  { %409 = vadd.xlane.f32.xlu0 %v408_v10 }
 0x30f   :  { %v401_v11 = vpop.permute.xlu1 %400  ;;  %v399_v12 = vpop.permute.xlu0 %398 }
 0x310   :  { %v414_v13 = vsel %vm51_vm0, %v401_v11, 0.0  ;;  %v411_v14 = vsel %vm51_vm0, %v399_v12, 0.0 }
 0x311   :  { %415 = vadd.xlane.f32.xlu0 %v414_v13  ;;  %412 = vadd.xlane.f32.xlu1 %v411_v14 }
 0x313   :  { %v403_v15 = vpop.permute.xlu1 %402 }
 0x314   :  { %v417_v16 = vsel %vm51_vm0, %v403_v15, 0.0 }
 0x315   :  { %418 = vadd.xlane.f32.xlu0 %v417_v16  ;;  %369 = vadd.xlane.f32.xlu1 %v368_v17 }
 0x319   :  { %372 = vadd.xlane.f32.xlu0 %v371_v18  ;;  %375 = vadd.xlane.f32.xlu1 %v374_v19 }
 0x31d   :  { %378 = vadd.xlane.f32.xlu0 %v377_v20 }
 0x39a   :  { %v410_v33 = vpop.xlane.xlu0 %409 }
 0x39b   :  { %v420_v34 = vmax.f32 %v410_v33, 1e-24 }
 0x39d   :  { %922 = vrsqrt.f32 %v420_v34 }
 0x39e   :  { %v413_v35 = vpop.xlane.xlu1 %412  ;;  %v416_v36 = vpop.xlane.xlu0 %415 }
 0x39f   :  { %v421_v37 = vmax.f32 %v413_v35, 1e-24  ;;  %v422_v38 = vmax.f32 %v416_v36, 1e-24 }
 0x3a1   :  { %924 = vrsqrt.f32 %v421_v37 }
 0x3a2   :  { %926 = vrsqrt.f32 %v422_v38  ;;  %v419_v39 = vpop.xlane.xlu0 %418  ;;  %v370_v40 = vpop.xlane.xlu1 %369 }
 0x3a3   :  { %v423_v41 = vmax.f32 %v419_v39, 1e-24  ;;  %v380_v42 = vmax.f32 %v370_v40, 1e-24 }
 0x3a5   :  { %928 = vrsqrt.f32 %v423_v41 }
 0x3a6   :  { %930 = vrsqrt.f32 %v380_v42  ;;  %v373_v43 = vpop.xlane.xlu0 %372  ;;  %v376_v44 = vpop.xlane.xlu1 %375 }
 0x3a7   :  { %v923_v45 = vpop.eup %922  ;;  %v381_v46 = vmax.f32 %v373_v43, 1e-24  ;;  %v382_v47 = vmax.f32 %v376_v44, 1e-24 }
 0x3a8   :  { %v428_v48 = vmul.f32 %v923_v45, %v1088_v63 }
 0x3a9   :  { %932 = vrsqrt.f32 %v381_v46 }
 0x3aa   :  { %934 = vrsqrt.f32 %v382_v47  ;;  %v379_v49 = vpop.xlane.xlu0 %378  ;;  %442 = vrot.lane.b32.xlu1 %v428_v48, %s962_s15 }
 0x3ab   :  { %v925_v50 = vpop.eup %924  ;;  %v383_v51 = vmax.f32 %v379_v49, 1e-24 }
 0x3ac   :  { %v927_v52 = vpop.eup %926  ;;  %v429_v53 = vmul.f32 %v925_v50, %v1090_v0 }
 0x3ad   :  { %936 = vrsqrt.f32 %v383_v51  ;;  %v430_v54 = vmul.f32 %v927_v52, %v1094_v4 }
 0x3ae   :  { %444 = vrot.lane.b32.xlu0 %v429_v53, %s962_s15 }
 0x3af   :  { %v929_v55 = vpop.eup %928  ;;  %543 = vrot.lane.b32.xlu1 %v430_v54, %s962_s15 }
 0x3b0   :  { %v931_v56 = vpop.eup %930  ;;  %v431_v57 = vmul.f32 %v929_v55, %v1097_v5 }
 0x3b1   :  { %v388_v58 = vmul.f32 %v931_v56, %v1088_v63 }
 0x3b3   :  { %v933_v59 = vpop.eup %932  ;;  %545 = vrot.lane.b32.xlu1 %v431_v57, %s962_s15  ;;  %834 = vmatprep.mubr.msk.f32.mxu1 %vm51_vm0, %v388_v58 }
 0x3b4   :  { %v935_v60 = vpop.eup %934  ;;  %v389_v61 = vmul.f32 %v933_v59, %v1090_v0 }
 0x3b5   :  { %v390_v62 = vmul.f32 %v935_v60, %v1094_v4 }
 0x3b6   :  { %835 = vmatmul.mubr.msk.f32.vlgmr.msra.gmra.mrb[4].mxu1 %vm51_vm0, %v389_v61 }
 0x3b7   :  { %v937_v1 = vpop.eup %936  ;;  %848 = vmatprep.mubr.msk.f32.mxu0 %vm51_vm0, %v390_v62  ;;  %912 = vmatpush3.bf16.msra.mxu1 %v902_v29 }
 0x3b8   :  { %v391_v2 = vmul.f32 %v937_v1, %v1097_v5  ;;  %911 = vmatprep.subr.bf16.mxu1 %v906_v32 }
 0x3ba   :  { %849 = vmatmul.mubr.msk.f32.vlgmr.msra.gmra.mrb[8].mxu0 %vm51_vm0, %v391_v2 }
 0x3bb   :  { %913 = vmatpush3.bf16.msra.mxu1 %v906_v32 }
 0x41c   :  { %v443_v63 = vpop.permute.xlu1 %442 }
 0x41d   :  { %837 = vmatprep.mubr.msk.f32.mxu1 %vm51_vm0, %v443_v63 }
 0x420   :  { %v445_v3 = vpop.permute.xlu0 %444 }
 0x421   :  { %v544_v6 = vpop.permute.xlu1 %543  ;;  %838 = vmatmul.mubr.msk.f32.gmra.mrb[6].mxu1 %vm51_vm0, %v445_v3 }
 0x422   :  { %851 = vmatprep.mubr.msk.f32.mxu1 %vm51_vm0, %v544_v6 }
 0x425   :  { %v546_v0 = vpop.permute.xlu1 %545 }
 0x426   :  { %852 = vmatmul.mubr.msk.f32.vlgmr.msra.gmra.mrb[8].mxu1 %vm51_vm0, %v546_v0 }
 0x489   :  { %v836_v4 = vpop.f32.mrb[4].mxu1 }
 0x48a   :  { %643 = vrot.lane.b32.xlu0 %v836_v4, %s963_s1  ;;  %v522_v5 = vpop.f32.mrb[5].mxu1 }
 0x48d   :  { %v850_v7 = vpop.f32.mrb[8].mxu0 }
 0x48e   :  { %659 = vrot.lane.b32.xlu0 %v850_v7, %s964_s30  ;;  %v623_v8 = vpop.f32.mrb[9].mxu0 }
 0x48f   :  { %655 = vrot.lane.b32.xlu1 %v623_v8, %s965_s5 }
 0x4f4   :  { %v839_v9 = vpop.f32.mrb[6].mxu1 }
 0x4f5   :  { %651 = vrot.lane.b32.xlu0 %v839_v9, %s966_s6  ;;  %v532_v10 = vpop.f32.mrb[7].mxu1 }
 0x4f6   :  { %647 = vrot.lane.b32.xlu1 %v532_v10, %s967_s7 }
 0x4f9   :  { %v853_v11 = vpop.f32.mrb[8].mxu1 }
 0x4fa   :  { %667 = vrot.lane.b32.xlu0 %v853_v11, %s968_s8  ;;  %v633_v12 = vpop.f32.mrb[9].mxu1 }
 0x4fb   :  { %663 = vrot.lane.b32.xlu1 %v633_v12, %s962_s15 }
 0x4fc   :  { %v644_v13 = vpop.permute.xlu0 %643 }
 0x4fd   :  { %v671_v16 = vsel %vm670_vm2, %v522_v5, %v644_v13 }
 0x500   :  { %v660_v14 = vpop.permute.xlu0 %659 }
 0x501   :  { %v656_v15 = vpop.permute.xlu1 %655 }
 0x567   :  { %v652_v17 = vpop.permute.xlu0 %651 }
 0x568   :  { %v648_v18 = vpop.permute.xlu1 %647 }
 0x569   :  { %v672_v19 = vsel %vm51_vm0, %v671_v16, %v648_v18 }
 0x56a   :  { %v674_v20 = vsel %vm673_vm3, %v672_v19, %v652_v17 }
 0x56b   :  { %v675_v21 = vsel %vm159_vm1, %v674_v20, %v656_v15 }
 0x56c   :  { %v677_v22 = vsel %vm676_vm4, %v675_v21, %v660_v14  ;;  %v668_v24 = vpop.permute.xlu0 %667 }
 0x56d   :  { %v664_v23 = vpop.permute.xlu1 %663 }
 0x56e   :  { %v679_v25 = vsel %vm678_vm5, %v677_v22, %v664_v23 }
 0x56f   :  { %v681_v26 = vsel %vm680_vm6, %v679_v25, %v668_v24 }
 0x570   :  { %682 = vst [vmem:[#allocation2] sm:$0xff] %v681_v26 }
 0x571   :  { %949 = shalt.err (!%p946_p4)
}
 0x572   :  { %s950_s2 = scalar_lea.hbm %s1179_s4, 128 }
 0x573   :  { %p951_p5 = scmp.ne.s32.totalorder %s1179_s4, %s950_s2  ;;  %p954_p6 = scmp.lt.u32.totalorder %s950_s2, %s1179_s4 }
 0x575   :  { %p956_p7 = pnand %p954_p6, %p951_p5 }
 0x577   :  { %959 = shalt.err (!%p956_p7)
}
 0x578   :  { %692 = dma.vmem_to_hbm [thread:$0]  %s690_s10, 128, %s1179_s4, [#allocation3]  }
 0x579   :  { %960 = dma.done.wait [#allocation3], 128  }
 0x57a   :  { %961 = vsyncadd [#allocation3], 4294967168 }
 0x57b   :  { %696 = vsyncpa [#allocation3], 1 }

</bundles_post_ra>
